<compile_context>
chip_gen: v5e
topology: v5e:2x2
jax: 0.10.0
libtpu: 0.0.40
codegen_flags: <defaults>
</compile_context>

<pallas_src>
import functools

import jax
import jax.numpy as jnp
from jax import lax
from jax.experimental import pallas as pl
from jax.experimental.pallas import tpu as pltpu

_LANES = 128                      # lane-dense packing width (full vreg lane dim)
_TILE_BUCKETS = (256, 2048, 8192)  # fixed set -> bounded recompiles


def _sin_feature_kernel(x_ref, o_ref):
    # Elementwise feature: sin(pi * x) on the current lane-dense tile.
    # TODO(synk): on v7x (3.2 TB/s HBM) the generic jnp.sin range reduction
    # can make the VALU slot the binding unit; a domain-restricted sinpi
    # polynomial would help there, but inputs are not guaranteed to lie in
    # [0, 1], so the exact path is kept.
    o_ref[...] = jnp.sin(x_ref[...] * jnp.pi)


@functools.partial(jax.jit, static_argnames=("row_tile",))
def _sin_feature_pallas(x2d, *, row_tile):
    """x2d: (rows, _LANES) lane-dense slab; grid is cdiv with a masked tail."""
    rows, lanes = x2d.shape
    grid = (pl.cdiv(rows, row_tile),)
    n_elems = rows * lanes
    itemsize = jnp.dtype(x2d.dtype).itemsize
    cost = pl.CostEstimate(
        flops=n_elems,                        # one mul per element
        transcendentals=n_elems,              # one sin per element
        bytes_accessed=2 * itemsize * n_elems,
    )
    return pl.pallas_call(
        _sin_feature_kernel,
        out_shape=jax.ShapeDtypeStruct((rows, lanes), x2d.dtype),
        grid_spec=pltpu.PrefetchScalarGridSpec(
            num_scalar_prefetch=0,
            grid=grid,
            in_specs=[pl.BlockSpec((row_tile, lanes), lambda i: (i, 0))],
            out_specs=pl.BlockSpec((row_tile, lanes), lambda i: (i, 0)),
        ),
        compiler_params=pltpu.CompilerParams(
            dimension_semantics=("parallel",),
        ),
        cost_estimate=cost,
    )(x2d)


def _round_up(x, m):
    return ((x + m - 1) // m) * m


@functools.lru_cache(maxsize=1)
def _max_row_tile():
    """Largest row tile for this chip generation (block bytes = tile*128*4)."""
    try:
        kind = jax.devices()[0].device_kind.lower()
    except Exception:  # pragma: no cover - CPU / unknown backends
        kind = ""
    if "v5" in kind:
        # v5e (~0.82 TB/s HBM, 16 MiB scoped VMEM default): 1 MiB blocks are
        # already ~90% of roofline; keep the tile capped to stay under the
        # scoped limit without touching vmem_limit_bytes.
        return 2048
    if "7" in kind:
        # v7x (3.2 TB/s HBM per TC): need ~4 MiB blocks to beat the per-step
        # overhead; 2 arrays x 2 buffers x 4 MiB = 16 MiB < 32 MiB default.
        return 8192
    # v6e and anything unrecognized: 1 MiB blocks.
    return 2048


def _pick_tile(rows, dtype):
    """Pick a row tile from a small fixed bucket set (bounded recompiles)."""
    itemsize = max(1, jnp.dtype(dtype).itemsize)
    sub = max(8, 8 * (4 // itemsize))          # 8 f32 / 16 bf16 / 32 int8-fp8
    max_tile = _max_row_tile()
    if rows < _TILE_BUCKETS[0]:
        # Tiny slab (normally handled by the fused fallback): single block,
        # sublane-rounded so the (sub,128) tiling rule holds for any dtype.
        return max(sub, _round_up(rows, sub))
    buckets = sorted({b for b in _TILE_BUCKETS if b <= max_tile} | {max_tile})
    # Prefer the largest bucket that still yields >= 2 grid steps, so the
    # "parallel" axis can shard across v7x's two TensorCores.
    for b in reversed(buckets):
        if pl.cdiv(rows, b) >= 2:
            return b
    return buckets[0]


class SinFeature:
    """JAX/Pallas port of the PyTorch SinFeature module.

    `input_labels` gives the column names of the input tensor (LabelTensor
    labels); `label` selects which column(s) the feature is computed on.
    """

    def __init__(self, label, input_labels):
        if not isinstance(label, (tuple, list)):
            label = [label]
        self._label = list(label)
        self._input_labels = list(input_labels)
        # LabelTensor.extract -> static column indices.
        self._col_idx = tuple(self._input_labels.index(l) for l in self._label)
        # Output labels (LabelTensor wrapper metadata only).
        self.output_labels = [f"sin({self._label})"]

    def _extract(self, x):
        """LabelTensor.extract with static slices only (no gather)."""
        idx = self._col_idx
        if len(idx) == 1:
            return lax.slice_in_dim(x, idx[0], idx[0] + 1, axis=1)
        if idx == tuple(range(idx[0], idx[0] + len(idx))):
            # Contiguous label block -> single static slice.
            return lax.slice_in_dim(x, idx[0], idx[0] + len(idx), axis=1)
        # Non-contiguous labels: concat of static 1-column slices (no gather).
        return jnp.concatenate(
            [lax.slice_in_dim(x, c, c + 1, axis=1) for c in idx], axis=1
        )

    def __call__(self, x, min_pallas_elems=1 << 15):
        # Glue: column extraction (LabelTensor.extract) via static slices.
        x_cols = self._extract(x)
        n, k = x_cols.shape
        total = n * k

        # Tiny inputs: a standalone kernel launch + repack costs more than
        # letting XLA fuse slice+sin with its neighbors.
        if total < min_pallas_elems:
            return jnp.sin(x_cols * jnp.pi)

        # Lane-dense repack: flatten (N, k) -> (rows, 128).  Pad only when
        # total is not already a multiple of 128 (common case: no pad copy,
        # and the unpack below is a free reshape).
        rows = pl.cdiv(total, _LANES)
        flat = x_cols.reshape(-1)
        pad = rows * _LANES - total
        if pad > 0:
            flat = jnp.pad(flat, (0, pad))       # zeros: sin(0)=0, sliced off
        x2d = flat.reshape(rows, _LANES)

        # Hot path: sin(pi * x) on the lane-dense slab, cdiv grid, masked tail.
        tile = _pick_tile(rows, x2d.dtype)
        out2d = _sin_feature_pallas(x2d, row_tile=tile)

        # Unpack back to (N, k) -- a copy only when a pad was actually added.
        out_flat = out2d.reshape(-1)
        if pad > 0:
            out_flat = out_flat[:total]
        out = out_flat.reshape(n, k)
        # TODO(synk): LabelTensor output-label wrapping has no Pallas/JAX
        # equivalent; we return the plain array (labels in self.output_labels).
        return out


if __name__ == "__main__":
    key = jax.random.PRNGKey(0)
    # Small input consistent with a 2D Poisson problem: N collocation points,
    # 2 labeled spatial coordinates ['x', 'y'].  N is deliberately NOT a
    # multiple of 128 to exercise the padded path.
    N, D = 1000, 2
    x = jax.random.uniform(key, (N, D), dtype=jnp.float32)

    # Single-label feature, forcing the Pallas path (min_pallas_elems=0).
    feat_x = SinFeature(label="x", input_labels=["x", "y"])
    out_x = jax.block_until_ready(feat_x(x, min_pallas_elems=0))
    ref_x = jnp.sin(x[:, 0:1] * jnp.pi)
    assert out_x.shape == (N, 1), out_x.shape
    assert jnp.allclose(out_x, ref_x, atol=1e-6, rtol=1e-6)

    # Multi-label feature (contiguous columns -> single static slice).
    feat_xy = SinFeature(label=["x", "y"], input_labels=["x", "y"])
    out_xy = jax.block_until_ready(feat_xy(x, min_pallas_elems=0))
    ref_xy = jnp.sin(x * jnp.pi)
    assert out_xy.shape == (N, 2), out_xy.shape
    assert jnp.allclose(out_xy, ref_xy, atol=1e-6, rtol=1e-6)

    # Moderate input: total = 16512*2 = 33024 elems (multiple of 128 -> zero
    # pad copy), rows = 258 -> bucketed tile 256 -> 2-step cdiv grid with a
    # masked ragged tail.  Large enough to take the Pallas path by default.
    key2 = jax.random.PRNGKey(1)
    x_big = jax.random.uniform(key2, (16512, 2), dtype=jnp.float32)
    out_big = jax.block_until_ready(feat_xy(x_big))
    assert out_big.shape == x_big.shape
    assert jnp.allclose(out_big, jnp.sin(x_big * jnp.pi), atol=1e-6, rtol=1e-6)

    # Small-input fallback path (no kernel launch) still matches.
    out_small = jax.block_until_ready(feat_x(x[:16]))
    assert jnp.allclose(out_small, jnp.sin(x[:16, 0:1] * jnp.pi),
                        atol=1e-6, rtol=1e-6)

    print("KERNEL_OK")
</pallas_src>

<mosaic_0001>
module attributes {stable_mosaic.version = 11 : i64} {
  func.func @_sin_feature_kernel(%arg0: i32, %arg1: memref<8x128xf32, #tpu.memory_space<vmem>>, %arg2: memref<8x128xf32, #tpu.memory_space<vmem>>) attributes {dimension_semantics = [#tpu.dimension_semantics<parallel>], iteration_bounds = array<i64: 1>, scalar_prefetch = 0 : i64, scratch_operands = 0 : i64, tpu.core_type = #tpu.core_type<tc>, window_params = [{transform_indices = @transform_0, window_bounds = array<i64: 8, 128>}, {transform_indices = @transform_1, window_bounds = array<i64: 8, 128>}]} {
    %c0 = arith.constant 0 : index
    %c0_0 = arith.constant 0 : index
    %0 = vector.load %arg1[%c0, %c0_0] : memref<8x128xf32, #tpu.memory_space<vmem>>, vector<8x128xf32>
    %cst = arith.constant 3.14159274 : f32
    %1 = vector.broadcast %cst : f32 to vector<8x128xf32>
    %2 = arith.mulf %0, %1 : vector<8x128xf32>
    %3 = math.sin %2 : vector<8x128xf32>
    %c0_1 = arith.constant 0 : index
    %c0_2 = arith.constant 0 : index
    %4 = vector.load %arg2[%c0_1, %c0_2] : memref<8x128xf32, #tpu.memory_space<vmem>>, vector<8x128xf32>
    tpu.vector_store %arg2[%c0_1, %c0_2], %3 {strides = array<i32>} : memref<8x128xf32, #tpu.memory_space<vmem>>, vector<8x128xf32>,
    return
  }
  func.func @transform_0(%arg0: i32) -> (i32, i32) {
    %c0_i32 = arith.constant 0 : i32
    %c0_i32_0 = arith.constant 0 : i32
    return %arg0, %c0_i32 : i32, i32
  }
  func.func @transform_1(%arg0: i32) -> (i32, i32) {
    %c0_i32 = arith.constant 0 : i32
    %c0_i32_0 = arith.constant 0 : i32
    return %arg0, %c0_i32 : i32, i32
  }
}

</mosaic_0001>

<bundles_post_ra>
// kernel: _sin_feature_pallas.1
= control target key start
LH: loop header
LB: loop body
LE: loop exit
PB: predicated region body
PF: predicated region fallthrough
CT: control target
= control target key end

     0   :  { %6 = vsyncpa [#allocation3], 0  ;;  %s333_s0 = inlined_call_operand.hbm [shape: f32[8,128], index: 0, kind: input, shape index: {}]   ;;  %s334_s1 = inlined_call_operand.hbm [shape: f32[8,128], index: 1, kind: output, shape index: {}]  }
   0x1   :  { %7 = vsyncpa [#allocation4], 0  ;;  %s13_s8 = sshll.u32 %s333_s0, 4  ;;  %s262_s9 = smov [#allocation2]   ;;  %s14_s8 = int_to_ptr.hbm [resolvable:$true] %s13_s8 }
   0x2   :  { %s15_s10 = sshll.u32 %s262_s9, 4  ;;  %s16_s10 = int_to_ptr.vmem [resolvable:$true] %s15_s10 }
   0x3   :  { %18 = dma.hbm_to_vmem [thread:$0]  %s14_s8, 128, %s16_s10, [#allocation3]  }
   0x4   :  { %258 = dma.done.wait [#allocation3], 128  }
   0x5   :  { %259 = vsyncadd [#allocation3], 4294967168  ;;  %v23_v0 = vld [vmem:[#allocation2] sm:$0xff]  ;;  %v263_v13 = vmov 683565275   ;;  %s270_s0 = smov [#allocation5]  }
   0x6   :  { %v284_v1 = vmul.f32 3.1415927, %v23_v0  ;;  %v264_v15 = vmov 2475754826   ;;  %v265_v17 = vmov 2131351028  }
   0x7   :  { %v266_v19 = vmov 2102212464   ;;  %v267_v21 = vmov 920167782   ;;  %v268_v27 = vmov 1326507024  }
   0x8   :  { %v28_v2 = vand.u32 2139095040, %v284_v1  ;;  %v25_v4 = vand.u32 2147483647, %v284_v1  ;;  %vm27_vm12 = vcmp.lt.s32.totalorder %v284_v1, 0  ;;  %s186_s11 = sshll.u32 %s270_s0, 4  ;;  %s188_s14 = sshll.u32 %s334_s1, 4  ;;  %s187_s11 = int_to_ptr.vmem [resolvable:$true] %s186_s11  ;;  %s189_s14 = int_to_ptr.hbm [resolvable:$true] %s188_s14 }
   0xa   :  { %v29_v3 = vshrl.u32 %v28_v2, 23  ;;  %v32_v7 = vand.u32 8388607, %v25_v4  ;;  %v269_v2 = vmov 0   ;;  %vm26_vm13 = vcmp.le.f32.partialorder %v25_v4, 0.7853982 }
   0xc   :  { %v198_v5 = vadd.s32 4294967169, %v29_v3  ;;  %v33_v10 = vor.u32 8388608, %v32_v7 }
   0xe   :  { %v35_v6 = vadd.s32 1, %v198_v5  ;;  %v293_v29 = vshll.u32 %v33_v10, 8 }
  0x10   :  { %vm36_vm0 = vcmp.gt.s32.totalorder %v35_v6, 0  ;;  %v74_v41 = vand.u32 65535, %v293_v29  ;;  %v75_v42 = vshrl.u32 %v293_v29, 16 }
  0x11   :  { %v37_v8 = vsel %vm36_vm0, %v35_v6, 0 }
  0x12   :  { %v39_v9 = vand.u32 31, %v37_v8  ;;  %v290_v11 = vshrl.u32 %v37_v8, 5 }
  0x14   :  { %v40_v12 = vsub.s32 32, %v39_v9  ;;  %v42_v14 = vshll.u32 %v263_v13, %v39_v9  ;;  %v45_v16 = vshll.u32 %v264_v15, %v39_v9  ;;  %v48_v18 = vshll.u32 %v265_v17, %v39_v9 }
  0x15   :  { %v51_v20 = vshll.u32 %v266_v19, %v39_v9  ;;  %v54_v22 = vshll.u32 %v267_v21, %v39_v9  ;;  %vm57_vm1 = vcmp.lt.s32.totalorder %v290_v11, 1  ;;  %vm60_vm2 = vcmp.lt.s32.totalorder %v290_v11, 4 }
  0x16   :  { %v43_v23 = vshrl.u32 %v264_v15, %v40_v12  ;;  %v46_v24 = vshrl.u32 %v265_v17, %v40_v12  ;;  %v49_v25 = vshrl.u32 %v266_v19, %v40_v12  ;;  %v52_v26 = vshrl.u32 %v267_v21, %v40_v12 }
  0x17   :  { %v55_v28 = vshrl.u32 %v268_v27, %v40_v12  ;;  %vm59_vm3 = vcmp.lt.s32.totalorder %v290_v11, 3  ;;  %vm58_vm4 = vcmp.lt.s32.totalorder %v290_v11, 2  ;;  %v41_v49 = vshrl.u32 %v263_v13, %v40_v12 }
  0x18   :  { %v44_v30 = vor.u32 %v43_v23, %v42_v14  ;;  %v47_v31 = vor.u32 %v46_v24, %v45_v16  ;;  %v50_v32 = vor.u32 %v49_v25, %v48_v18  ;;  %v53_v33 = vor.u32 %v52_v26, %v51_v20 }
  0x19   :  { %v56_v34 = vor.u32 %v55_v28, %v54_v22 }
  0x1a   :  { %v65_v35 = vsel %vm57_vm1, %v44_v30, %v47_v31  ;;  %v69_v36 = vsel %vm57_vm1, %v47_v31, %v50_v32  ;;  %v66_v37 = vsel %vm60_vm2, %v53_v33, 920167782  ;;  %v61_v62 = vsel %vm57_vm1, %v41_v49, %v44_v30 }
  0x1b   :  { %v70_v38 = vsel %vm60_vm2, %v56_v34, 1326507024  ;;  %v67_v39 = vsel %vm59_vm3, %v50_v32, %v66_v37  ;;  %v62_v0 = vsel %vm60_vm2, %v50_v32, 2102212464  ;;  %vm168_vm1 = vweird.f32 %v284_v1 }
  0x1c   :  { %v71_v40 = vsel %vm59_vm3, %v53_v33, %v70_v38  ;;  %v68_v43 = vsel %vm58_vm4, %v65_v35, %v67_v39  ;;  %v63_v13 = vsel %vm59_vm3, %v47_v31, %v62_v0 }
  0x1d   :  { %v72_v44 = vsel %vm58_vm4, %v69_v36, %v71_v40  ;;  %v98_v47 = vand.u32 65535, %v68_v43  ;;  %v99_v48 = vshrl.u32 %v68_v43, 16  ;;  %v64_v21 = vsel %vm58_vm4, %v61_v62, %v63_v13 }
  0x1e   :  { %v76_v45 = vand.u32 65535, %v72_v44  ;;  %v77_v46 = vshrl.u32 %v72_v44, 16  ;;  %v118_v25 = vmul.u32 %v293_v29, %v64_v21 }
  0x1f   :  { %v100_v53 = vmul.u32 %v98_v47, %v74_v41  ;;  %v101_v54 = vmul.u32 %v99_v48, %v74_v41  ;;  %v102_v55 = vmul.u32 %v98_v47, %v75_v42  ;;  %v103_v59 = vmul.u32 %v99_v48, %v75_v42 }
  0x20   :  { %v78_v50 = vmul.u32 %v76_v45, %v74_v41  ;;  %v79_v51 = vmul.u32 %v77_v46, %v74_v41  ;;  %v80_v52 = vmul.u32 %v76_v45, %v75_v42  ;;  %v81_v56 = vmul.u32 %v77_v46, %v75_v42 }
  0x21   :  { %v104_v60 = vshll.u32 %v101_v54, 16  ;;  %v106_v61 = vshll.u32 %v102_v55, 16  ;;  %v105_v10 = vshrl.u32 %v101_v54, 16  ;;  %v107_v17 = vshrl.u32 %v102_v55, 16 }
  0x22   :  { %v82_v57 = vshll.u32 %v79_v51, 16  ;;  %v84_v58 = vshll.u32 %v80_v52, 16  ;;  %v83_v6 = vshrl.u32 %v79_v51, 16  ;;  %v85_v14 = vshrl.u32 %v80_v52, 16 }
  0x23   :  { %vm108_vm6 = vc.u32 %v100_v53, %v104_v60  ;;  %v110_v5 = vadd.s32 %v104_v60, %v100_v53 }
  0x24   :  { %vm86_vm5 = vc.u32 %v78_v50, %v82_v57  ;;  %v88_v63 = vadd.s32 %v82_v57, %v78_v50  ;;  %v109_v8 = vsel %vm108_vm6, 1, %v269_v2 }
  0x25   :  { %v87_v3 = vsel %vm86_vm5, 1, %v269_v2  ;;  %v111_v12 = vadd.s32 %v109_v8, %v103_v59  ;;  %vm112_vm8 = vc.u32 %v110_v5, %v106_v61  ;;  %v114_v20 = vadd.s32 %v110_v5, %v106_v61 }
  0x26   :  { %v89_v7 = vadd.s32 %v87_v3, %v81_v56  ;;  %vm90_vm7 = vc.u32 %v88_v63, %v84_v58  ;;  %v113_v16 = vsel %vm112_vm8, 1, %v269_v2 }
  0x27   :  { %v91_v9 = vsel %vm90_vm7, 1, %v269_v2  ;;  %v115_v18 = vadd.s32 %v113_v16, %v111_v12 }
  0x28   :  { %v93_v15 = vadd.s32 %v91_v9, %v89_v7 }
  0x29   :  { %v116_v22 = vadd.s32 %v115_v18, %v105_v10 }
  0x2a   :  { %v94_v19 = vadd.s32 %v93_v15, %v83_v6 }
  0x2b   :  { %v117_v24 = vadd.s32 %v116_v22, %v107_v17 }
  0x2c   :  { %v95_v23 = vadd.s32 %v94_v19, %v85_v14 }
  0x2d   :  { %v121_v26 = vadd.s32 1, %v117_v24 }
  0x2e   :  { %vm120_vm9 = vc.u32 %v95_v23, %v114_v20  ;;  %v119_v11 = vadd.s32 %v114_v20, %v95_v23 }
  0x2f   :  { %v122_v27 = vsel %vm120_vm9, %v121_v26, %v117_v24 }
  0x30   :  { %v123_v28 = vadd.s32 %v122_v27, %v118_v25 }
  0x32   :  { %v124_v30 = vadd.s32 536870912, %v123_v28 }
  0x34   :  { %v125_v31 = vshrl.u32 %v124_v30, 30 }
  0x36   :  { %v126_v32 = vshll.u32 %v125_v31, 30  ;;  %v149_v49 = vsub.s32 4, %v125_v31 }
  0x38   :  { %v127_v33 = vsub.s32 %v123_v28, %v126_v32  ;;  %v150_v52 = vsel %vm27_vm12, %v149_v49, %v125_v31 }
  0x39   :  { %v152_v55 = vsel %vm26_vm13, 0, %v150_v52 }
  0x3a   :  { %vm128_vm10 = vcmp.lt.s32.totalorder %v127_v33, 0  ;;  %v129_v34 = vsub.s32 0, %v127_v33  ;;  %v169_v60 = vadd.s32 3, %v152_v55 }
  0x3c   :  { %v130_v35 = vsel %vm128_vm10, %v129_v34, %v127_v33  ;;  %v170_v2 = vand.u32 3, %v169_v60 }
  0x3d   :  { %v131_v36 = vclz %v130_v35 }
  0x3e   :  { %vm175_vm14 = vcmp.eq.s32.totalorder %v170_v2, 2  ;;  %vm172_vm15 = vcmp.eq.s32.totalorder %v170_v2, 0  ;;  %vm171_vm0 = vcmp.lt.s32.totalorder %v170_v2, 2 }
  0x3f   :  { %v199_v37 = vadd.s32 4294967294, %v131_v36 }
  0x41   :  { %vm200_vm11 = vcmp.lt.s32.totalorder %v199_v37, 0 }
  0x42   :  { %v134_v38 = vsel %vm200_vm11, 0, %v199_v37 }
  0x43   :  { %v135_v39 = vsub.s32 32, %v134_v38  ;;  %v136_v40 = vshll.u32 %v127_v33, %v134_v38  ;;  %v139_v41 = vsub.s32 4294967266, %v134_v38 }
  0x45   :  { %v137_v29 = vshrl.u32 %v119_v11, %v135_v39  ;;  %v140_v42 = vadd.s32 127, %v139_v41 }
  0x47   :  { %v138_v43 = vor.u32 %v137_v29, %v136_v40  ;;  %v141_v44 = vshll.u32 %v140_v42, 23 }
  0x49   :  { %v142_v45 = vor.u32 4788187, %v141_v44  ;;  %v145_v46 = vcvt.s32.f32 %v138_v43 }
  0x4b   :  { %v143_v47 = vand.u32 2147483647, %v142_v45 }
  0x4d   :  { %v146_v48 = vmul.f32 %v145_v46, %v143_v47 }
  0x4f   :  { %v147_v50 = vxor.u32 2147483648, %v146_v48 }
  0x51   :  { %v148_v51 = vsel %vm27_vm12, %v147_v50, %v146_v48 }
  0x52   :  { %v151_v53 = vsel %vm26_vm13, %v284_v1, %v148_v51 }
  0x53   :  { %v153_v54 = vmul.f32 %v151_v53, %v151_v53 }
  0x55   :  { %v154_v56 = vmul.f32 -0.001358992, %v153_v54  ;;  %v161_v57 = vmul.f32 -0.00019511016, %v153_v54 }
  0x57   :  { %v155_v58 = vadd.f32 0.041655596, %v154_v56  ;;  %v162_v59 = vadd.f32 0.008332121, %v161_v57 }
  0x59   :  { %v156_v61 = vmul.f32 %v155_v58, %v153_v54  ;;  %v163_v62 = vmul.f32 %v162_v59, %v153_v54 }
  0x5b   :  { %v157_v63 = vadd.f32 -0.4999988, %v156_v61  ;;  %v164_v0 = vadd.f32 -0.16666654, %v163_v62 }
  0x5d   :  { %v158_v3 = vmul.f32 %v157_v63, %v153_v54  ;;  %v165_v5 = vmul.f32 %v164_v0, %v153_v54 }
  0x5f   :  { %v159_v4 = vadd.f32 1.0, %v158_v3  ;;  %v166_v6 = vadd.f32 1.0, %v165_v5 }
  0x61   :  { %v167_v7 = vmul.f32 %v166_v6, %v151_v53  ;;  %v176_v8 = vxor.u32 2147483648, %v159_v4 }
  0x63   :  { %v173_v9 = vxor.u32 2147483648, %v167_v7  ;;  %v177_v10 = vsel %vm175_vm14, %v176_v8, %v167_v7 }
  0x65   :  { %v174_v12 = vsel %vm172_vm15, %v159_v4, %v173_v9 }
  0x66   :  { %v178_v13 = vsel %vm171_vm0, %v174_v12, %v177_v10 }
  0x67   :  { %v179_v14 = vsel %vm168_vm1, nan, %v178_v13 }
  0x68   :  { %180 = vst [vmem:[#allocation5] sm:$0xff] %v179_v14 }
  0x69   :  { %191 = dma.vmem_to_hbm [thread:$0]  %s187_s11, 128, %s189_s14, [#allocation4]  }
  0x6a   :  { %260 = dma.done.wait [#allocation4], 128  }
  0x6b   :  { %261 = vsyncadd [#allocation4], 4294967168 }
  0x6c   :  { %196 = vsyncpa [#allocation3], 1 }
  0x6d   :  { %197 = vsyncpa [#allocation4], 1 }

</bundles_post_ra>
